<compile_context>
chip_gen: v6e
topology: v6e:2x2x1
jax: 0.10.0
libtpu: 0.0.40
codegen_flags: <defaults>
</compile_context>

<pallas_src>
import functools

import jax
import jax.numpy as jnp
from jax.experimental import pallas as pl
from jax.experimental.pallas import tpu as pltpu

IN_FEATURES = 784
HIDDEN = 50
OUT_FEATURES = 10

HIDDEN_PAD = 128   # lane-aligned hidden width
OUT_PAD = 128      # lane-dense output block width (unmasked vst)
NEG_BIG = -1e30    # effectively -inf for padded logit columns


def _round_up(n, m):
    return ((n + m - 1) // m) * m


def _mlp_log_softmax_kernel(x_ref, w1_ref, b1_ref, w2_ref, b2_ref, out_ref):
    """Fused fc3 + ReLU + fc4 + log_softmax for one batch tile.

    x_ref:  (TB, 784)   f32 or bf16
    w1_ref: (784, 128)  same dtype as x   (columns 50..127 are zero)
    b1_ref: (1, 128)    f32               (entries 50..127 are zero)
    w2_ref: (128, 128)  f32               (rows 50.. and cols 10.. are zero)
    b2_ref: (1, 128)    f32               (entries 10..127 are -1e30)
    out_ref:(TB, 128)   f32               (columns 10..127 are padding)
    """
    # fc3 + ReLU; f32 accumulation regardless of input dtype.
    h = jnp.dot(x_ref[...], w1_ref[...],
                preferred_element_type=jnp.float32) + b1_ref[...]
    h = jnp.maximum(h, 0.0)

    # fc4 (padded logit columns come out ~ -1e30).
    logits = jnp.dot(h, w2_ref[...],
                     preferred_element_type=jnp.float32) + b2_ref[...]

    # Row-wise log_softmax; padded columns contribute exp(~-1e30) = 0.
    m = jnp.max(logits, axis=-1, keepdims=True)
    shifted = logits - m
    lse = jnp.log(jnp.sum(jnp.exp(shifted), axis=-1, keepdims=True))
    out_ref[...] = shifted - lse


def _choose_tile(batch, batch_tile):
    """Pick the batch tile.

    * B > batch_tile: use batch_tile (grid >= 2 steps automatically).
    * 256 <= B <= batch_tile: split into >= 2 grid steps so v7x's two
      TensorCores both get work along the "parallel" axis.
    * B < 256: one full-array block (block dim == array dim, so no masking,
      no sublane-multiple requirement).
    """
    if batch > batch_tile:
        return batch_tile
    if batch >= 256:
        return _round_up(-(-batch // 2), 8)   # multiple of 8, <= batch
    return batch


def _net_forward_padded(x, w1, b1, w2, b2, batch_tile, input_dtype):
    B = x.shape[0]
    tile = _choose_tile(B, batch_tile)
    grid = (pl.cdiv(B, tile),)

    x_in = x.astype(input_dtype)

    # Pad weights/biases to lane-dense shapes (tiny arrays).
    w1_pad = jnp.pad(w1, ((0, 0), (0, HIDDEN_PAD - HIDDEN))).astype(input_dtype)
    b1_pad = jnp.pad(b1.reshape(1, HIDDEN), ((0, 0), (0, HIDDEN_PAD - HIDDEN)))
    w2_pad = jnp.pad(w2, ((0, HIDDEN_PAD - HIDDEN), (0, OUT_PAD - OUT_FEATURES)))
    b2_pad = jnp.pad(b2.reshape(1, OUT_FEATURES),
                     ((0, 0), (0, OUT_PAD - OUT_FEATURES)),
                     constant_values=NEG_BIG)

    return pl.pallas_call(
        _mlp_log_softmax_kernel,
        out_shape=jax.ShapeDtypeStruct((B, OUT_PAD), jnp.float32),
        grid=grid,
        in_specs=[
            pl.BlockSpec((tile, IN_FEATURES), lambda i: (i, 0)),
            pl.BlockSpec((IN_FEATURES, HIDDEN_PAD), lambda i: (0, 0)),
            pl.BlockSpec((1, HIDDEN_PAD), lambda i: (0, 0)),
            pl.BlockSpec((HIDDEN_PAD, OUT_PAD), lambda i: (0, 0)),
            pl.BlockSpec((1, OUT_PAD), lambda i: (0, 0)),
        ],
        out_specs=pl.BlockSpec((tile, OUT_PAD), lambda i: (i, 0)),
        compiler_params=pltpu.CompilerParams(
            dimension_semantics=("parallel",),
            vmem_limit_bytes=32 * 1024 * 1024,  # v5e scoped default is 16 MiB
        ),
    )(x_in, w1_pad, b1_pad, w2_pad, b2_pad)


@functools.partial(jax.jit, static_argnames=("batch_tile", "input_dtype"))
def net_forward_padded(x, w1, b1, w2, b2, *, batch_tile=2048,
                       input_dtype=jnp.float32):
    """Lane-dense (B, 128) log-prob slab; columns 10..127 are padding.

    Preferred entry point when a downstream op (NLL loss, argmax) can consume
    the slab directly and avoid a materialized [:, :10] copy."""
    return _net_forward_padded(x, w1, b1, w2, b2, batch_tile, input_dtype)


@functools.partial(jax.jit, static_argnames=("batch_tile", "input_dtype"))
def net_forward(x, w1, b1, w2, b2, *, batch_tile=2048, input_dtype=jnp.float32):
    """Forward pass of Net: log_softmax(relu(x @ W1 + b1) @ W2 + b2).

    x:  (B, 784), any B >= 1.   Returns (B, 10) log-probabilities.
    Set input_dtype=jnp.bfloat16 for the fast matmul-1 path on v6e/v7x
    (f32 accumulation; relaxes accuracy to ~1e-2 on log-probs).
    """
    out = _net_forward_padded(x, w1, b1, w2, b2, batch_tile, input_dtype)
    # TODO(synk): under a larger jit, fuse this [:, :10] slice into the
    # consumer (or use net_forward_padded) to avoid the extra HBM round trip.
    return out[:, :OUT_FEATURES]


def init_params(key):
    """Deterministic init mimicking PyTorch Linear default (U(+-1/sqrt(fan_in)))."""
    k1, k2, k3, k4 = jax.random.split(key, 4)
    bound1 = 1.0 / jnp.sqrt(jnp.float32(IN_FEATURES))
    bound2 = 1.0 / jnp.sqrt(jnp.float32(HIDDEN))
    # Stored transposed relative to PyTorch's (out, in) convention.
    w1 = jax.random.uniform(k1, (IN_FEATURES, HIDDEN), jnp.float32, -bound1, bound1)
    b1 = jax.random.uniform(k2, (1, HIDDEN), jnp.float32, -bound1, bound1)
    w2 = jax.random.uniform(k3, (HIDDEN, OUT_FEATURES), jnp.float32, -bound2, bound2)
    b2 = jax.random.uniform(k4, (1, OUT_FEATURES), jnp.float32, -bound2, bound2)
    return w1, b1, w2, b2


def reference_forward(x, w1, b1, w2, b2):
    h = jnp.maximum(x @ w1 + b1.reshape(1, -1), 0.0)
    logits = h @ w2 + b2.reshape(1, -1)
    return jax.nn.log_softmax(logits, axis=1)


if __name__ == "__main__":
    key = jax.random.PRNGKey(0)
    kp, kx1, kx2, kx3 = jax.random.split(key, 4)
    w1, b1, w2, b2 = init_params(kp)

    # Small MNIST-style batch: single full-array block, no masking.
    x1 = jax.random.normal(kx1, (8, IN_FEATURES), jnp.float32)
    out1 = jax.block_until_ready(net_forward(x1, w1, b1, w2, b2))
    ref1 = reference_forward(x1, w1, b1, w2, b2)
    assert out1.shape == (8, OUT_FEATURES)
    assert jnp.allclose(out1, ref1, atol=1e-5, rtol=1e-5), "mismatch (B=8, f32)"

    # Non-multiple-of-8 batch: block dim == array dim path.
    x2 = jax.random.normal(kx2, (37, IN_FEATURES), jnp.float32)
    out2 = jax.block_until_ready(net_forward(x2, w1, b1, w2, b2))
    ref2 = reference_forward(x2, w1, b1, w2, b2)
    assert out2.shape == (37, OUT_FEATURES)
    assert jnp.allclose(out2, ref2, atol=1e-5, rtol=1e-5), "mismatch (B=37, f32)"

    # Mid-size batch: exercises the >=2-grid-step split and the ragged
    # (masked) last block with no wrapper-side padding of x.
    x3 = jax.random.normal(kx3, (300, IN_FEATURES), jnp.float32)
    out3 = jax.block_until_ready(net_forward(x3, w1, b1, w2, b2))
    ref3 = reference_forward(x3, w1, b1, w2, b2)
    assert out3.shape == (300, OUT_FEATURES)
    assert jnp.allclose(out3, ref3, atol=1e-5, rtol=1e-5), "mismatch (B=300, f32)"

    # bf16-input fast path (matmul-1 in bf16, f32 accumulation): relaxed tol.
    out_bf = jax.block_until_ready(
        net_forward(x1, w1, b1, w2, b2, input_dtype=jnp.bfloat16))
    assert out_bf.shape == (8, OUT_FEATURES)
    assert jnp.allclose(out_bf, ref1, atol=1e-1, rtol=5e-2), "mismatch (bf16)"

    # Lane-dense padded-slab entry point (for downstream fusion).
    slab = jax.block_until_ready(net_forward_padded(x1, w1, b1, w2, b2))
    assert slab.shape == (8, OUT_PAD)
    assert jnp.allclose(slab[:, :OUT_FEATURES], ref1, atol=1e-5, rtol=1e-5), \
        "mismatch (padded slab)"

    print("KERNEL_OK")
</pallas_src>

<mosaic_0001>
module attributes {stable_mosaic.version = 11 : i64} {
  func.func @_mlp_log_softmax_kernel(%arg0: i32, %arg1: memref<8x784xf32, #tpu.memory_space<vmem>>, %arg2: memref<784x128xf32, #tpu.memory_space<vmem>>, %arg3: memref<1x128xf32, #tpu.memory_space<vmem>>, %arg4: memref<128x128xf32, #tpu.memory_space<vmem>>, %arg5: memref<1x128xf32, #tpu.memory_space<vmem>>, %arg6: memref<8x128xf32, #tpu.memory_space<vmem>>) attributes {dimension_semantics = [#tpu.dimension_semantics<parallel>], iteration_bounds = array<i64: 1>, scalar_prefetch = 0 : i64, scratch_operands = 0 : i64, tpu.core_type = #tpu.core_type<tc>, window_params = [{transform_indices = @transform_0, window_bounds = array<i64: 8, 784>}, {pipeline_mode = #tpu.pipeline_mode<synchronous>, transform_indices = @transform_1, window_bounds = array<i64: 784, 128>}, {pipeline_mode = #tpu.pipeline_mode<synchronous>, transform_indices = @transform_2, window_bounds = array<i64: 1, 128>}, {pipeline_mode = #tpu.pipeline_mode<synchronous>, transform_indices = @transform_3, window_bounds = array<i64: 128, 128>}, {pipeline_mode = #tpu.pipeline_mode<synchronous>, transform_indices = @transform_4, window_bounds = array<i64: 1, 128>}, {transform_indices = @transform_5, window_bounds = array<i64: 8, 128>}]} {
    %c0 = arith.constant 0 : index
    %c0_0 = arith.constant 0 : index
    %0 = vector.load %arg1[%c0, %c0_0] : memref<8x784xf32, #tpu.memory_space<vmem>>, vector<8x784xf32>
    %c0_1 = arith.constant 0 : index
    %c0_2 = arith.constant 0 : index
    %1 = vector.load %arg2[%c0_1, %c0_2] : memref<784x128xf32, #tpu.memory_space<vmem>>, vector<784x128xf32>
    %cst = arith.constant dense<0.000000e+00> : vector<8x128xf32>
    %2 = tpu.matmul %0, %1, %cst {dimension_numbers = #tpu.dot_dimension_numbers<[1], [0], [0], [1], [0, 0, 1, 1], [], []>} : vector<8x784xf32>, vector<784x128xf32>, vector<8x128xf32> -> vector<8x128xf32>
    %c0_3 = arith.constant 0 : index
    %c0_4 = arith.constant 0 : index
    %3 = vector.load %arg3[%c0_3, %c0_4] : memref<1x128xf32, #tpu.memory_space<vmem>>, vector<1x128xf32>
    %4 = vector.broadcast %3 : vector<1x128xf32> to vector<8x128xf32>
    %5 = arith.addf %2, %4 : vector<8x128xf32>
    %cst_5 = arith.constant 0.000000e+00 : f32
    %6 = vector.broadcast %cst_5 : f32 to vector<8x128xf32>
    %7 = arith.maximumf %5, %6 : vector<8x128xf32>
    %c0_6 = arith.constant 0 : index
    %c0_7 = arith.constant 0 : index
    %8 = vector.load %arg4[%c0_6, %c0_7] : memref<128x128xf32, #tpu.memory_space<vmem>>, vector<128x128xf32>
    %cst_8 = arith.constant dense<0.000000e+00> : vector<8x128xf32>
    %9 = tpu.matmul %7, %8, %cst_8 {dimension_numbers = #tpu.dot_dimension_numbers<[1], [0], [0], [1], [0, 0, 1, 1], [], []>} : vector<8x128xf32>, vector<128x128xf32>, vector<8x128xf32> -> vector<8x128xf32>
    %c0_9 = arith.constant 0 : index
    %c0_10 = arith.constant 0 : index
    %10 = vector.load %arg5[%c0_9, %c0_10] : memref<1x128xf32, #tpu.memory_space<vmem>>, vector<1x128xf32>
    %11 = vector.broadcast %10 : vector<1x128xf32> to vector<8x128xf32>
    %12 = arith.addf %9, %11 : vector<8x128xf32>
    %cst_11 = arith.constant dense<0xFF800000> : vector<8xf32>
    %13 = vector.multi_reduction <maximumf>, %12, %cst_11 [1] : vector<8x128xf32> to vector<8xf32>
    %14 = vector.shape_cast %13 : vector<8xf32> to vector<8x1xf32>
    %15 = vector.broadcast %14 : vector<8x1xf32> to vector<8x128xf32>
    %16 = arith.subf %12, %15 : vector<8x128xf32>
    %17 = math.exp %16 : vector<8x128xf32>
    %cst_12 = arith.constant dense<0.000000e+00> : vector<8xf32>
    %18 = vector.multi_reduction <add>, %17, %cst_12 [1] : vector<8x128xf32> to vector<8xf32>
    %19 = vector.shape_cast %18 : vector<8xf32> to vector<8x1xf32>
    %20 = math.log %19 : vector<8x1xf32>
    %21 = vector.broadcast %20 : vector<8x1xf32> to vector<8x128xf32>
    %22 = arith.subf %16, %21 : vector<8x128xf32>
    %c0_13 = arith.constant 0 : index
    %c0_14 = arith.constant 0 : index
    %23 = vector.load %arg6[%c0_13, %c0_14] : memref<8x128xf32, #tpu.memory_space<vmem>>, vector<8x128xf32>
    tpu.vector_store %arg6[%c0_13, %c0_14], %22 {strides = array<i32>} : memref<8x128xf32, #tpu.memory_space<vmem>>, vector<8x128xf32>,
    return
  }
  func.func @transform_0(%arg0: i32) -> (i32, i32) {
    %c0_i32 = arith.constant 0 : i32
    %c0_i32_0 = arith.constant 0 : i32
    return %arg0, %c0_i32 : i32, i32
  }
  func.func @transform_1(%arg0: i32) -> (i32, i32) {
    %c0_i32 = arith.constant 0 : i32
    %c0_i32_0 = arith.constant 0 : i32
    %c0_i32_1 = arith.constant 0 : i32
    return %c0_i32, %c0_i32_0 : i32, i32
  }
  func.func @transform_2(%arg0: i32) -> (i32, i32) {
    %c0_i32 = arith.constant 0 : i32
    %c0_i32_0 = arith.constant 0 : i32
    %c0_i32_1 = arith.constant 0 : i32
    return %c0_i32, %c0_i32_0 : i32, i32
  }
  func.func @transform_3(%arg0: i32) -> (i32, i32) {
    %c0_i32 = arith.constant 0 : i32
    %c0_i32_0 = arith.constant 0 : i32
    %c0_i32_1 = arith.constant 0 : i32
    return %c0_i32, %c0_i32_0 : i32, i32
  }
  func.func @transform_4(%arg0: i32) -> (i32, i32) {
    %c0_i32 = arith.constant 0 : i32
    %c0_i32_0 = arith.constant 0 : i32
    %c0_i32_1 = arith.constant 0 : i32
    return %c0_i32, %c0_i32_0 : i32, i32
  }
  func.func @transform_5(%arg0: i32) -> (i32, i32) {
    %c0_i32 = arith.constant 0 : i32
    %c0_i32_0 = arith.constant 0 : i32
    return %arg0, %c0_i32 : i32, i32
  }
}

</mosaic_0001>

<bundles_post_ra>
// kernel: net_forward.1
= control target key start
LH: loop header
LB: loop body
LE: loop exit
PB: predicated region body
PF: predicated region fallthrough
CT: control target
= control target key end

     0   :  { %s1160_s0 = inlined_call_operand.vmem [shape: f32[8,784], index: 0, kind: input, shape index: {}]   ;;  %s1161_s1 = inlined_call_operand.vmem [shape: f32[784,128], index: 1, kind: input, shape index: {}]   ;;  %s1162_s2 = inlined_call_operand.vmem [shape: f32[1,128], index: 2, kind: input, shape index: {}]   ;;  %s1163_s3 = inlined_call_operand.vmem [shape: f32[128,128], index: 3, kind: input, shape index: {}]   ;;  %s1164_s4 = inlined_call_operand.vmem [shape: f32[1,128], index: 4, kind: input, shape index: {}]   ;;  %s1165_s5 = inlined_call_operand.hbm [shape: f32[8,128], index: 5, kind: output, shape index: {}]  }
   0x1   :  { %v59_v0 = vld [vmem:[%s1161_s1 + $0xf8] sm:$0xff]  ;;  %v58_v2 = vld [vmem:[%s1161_s1 + $0xf0] sm:$0xff]  ;;  %v57_v6 = vld [vmem:[%s1161_s1 + $0xe8] sm:$0xff] }
   0x2   :  { %v43_v1 = vld [vmem:[%s1161_s1 + $0x78] sm:$0xff]  ;;  %539 = vmatprep.subr.mxu0 %v59_v0  ;;  %v42_v4 = vld [vmem:[%s1161_s1 + $0x70] sm:$0xff]  ;;  %v41_v8 = vld [vmem:[%s1161_s1 + $0x68] sm:$0xff] }
   0x3   :  { %v91_v3 = vld [vmem:[%s1161_s1 + $0x1f8] sm:$0xff]  ;;  %540 = vmatpush3.msra.mxu0 %v43_v1  ;;  %v90_v7 = vld [vmem:[%s1161_s1 + $0x1f0] sm:$0xff]  ;;  %v89_v10 = vld [vmem:[%s1161_s1 + $0x1e8] sm:$0xff] }
   0x4   :  { %v75_v5 = vld [vmem:[%s1161_s1 + $0x178] sm:$0xff]  ;;  %574 = vmatprep.subr.mxu1 %v91_v3  ;;  %541 = vmatprep.subr.mxu0 %v58_v2  ;;  %v74_v9 = vld [vmem:[%s1161_s1 + $0x170] sm:$0xff]  ;;  %v56_v11 = vld [vmem:[%s1161_s1 + $0xe0] sm:$0xff] }
   0x5   :  { %575 = vmatpush3.msra.mxu1 %v75_v5  ;;  %542 = vmatpush3.msra.mxu0 %v42_v4  ;;  %v73_v12 = vld [vmem:[%s1161_s1 + $0x168] sm:$0xff]  ;;  %v40_v13 = vld [vmem:[%s1161_s1 + $0x60] sm:$0xff]  ;;  %v55_v15 = vld [vmem:[%s1161_s1 + $0xd8] sm:$0xff] }
   0x6   :  { %576 = vmatprep.subr.mxu1 %v90_v7  ;;  %543 = vmatprep.subr.mxu0 %v57_v6  ;;  %v88_v14 = vld [vmem:[%s1161_s1 + $0x1e0] sm:$0xff]  ;;  %v39_v17 = vld [vmem:[%s1161_s1 + $0x58] sm:$0xff]  ;;  %v54_v19 = vld [vmem:[%s1161_s1 + $0xd0] sm:$0xff] }
   0x7   :  { %577 = vmatpush3.msra.mxu1 %v74_v9  ;;  %544 = vmatpush3.msra.mxu0 %v41_v8  ;;  %v72_v16 = vld [vmem:[%s1161_s1 + $0x160] sm:$0xff]  ;;  %v87_v18 = vld [vmem:[%s1161_s1 + $0x1d8] sm:$0xff]  ;;  %v38_v21 = vld [vmem:[%s1161_s1 + $0x50] sm:$0xff] }
   0x8   :  { %578 = vmatprep.subr.mxu1 %v89_v10  ;;  %545 = vmatprep.subr.mxu0 %v56_v11  ;;  %v71_v20 = vld [vmem:[%s1161_s1 + $0x158] sm:$0xff]  ;;  %v86_v22 = vld [vmem:[%s1161_s1 + $0x1d0] sm:$0xff]  ;;  %v53_v23 = vld [vmem:[%s1161_s1 + $0xc8] sm:$0xff] }
   0x9   :  { %579 = vmatpush3.msra.mxu1 %v73_v12  ;;  %546 = vmatpush3.msra.mxu0 %v40_v13  ;;  %v70_v24 = vld [vmem:[%s1161_s1 + $0x150] sm:$0xff]  ;;  %v37_v25 = vld [vmem:[%s1161_s1 + $0x48] sm:$0xff]  ;;  %v52_v27 = vld [vmem:[%s1161_s1 + $0xc0] sm:$0xff] }
   0xa   :  { %580 = vmatprep.subr.mxu1 %v88_v14  ;;  %547 = vmatprep.subr.mxu0 %v55_v15  ;;  %v85_v26 = vld [vmem:[%s1161_s1 + $0x1c8] sm:$0xff]  ;;  %v36_v29 = vld [vmem:[%s1161_s1 + $0x40] sm:$0xff]  ;;  %v51_v31 = vld [vmem:[%s1161_s1 + $0xb8] sm:$0xff] }
   0xb   :  { %581 = vmatpush3.msra.mxu1 %v72_v16  ;;  %548 = vmatpush3.msra.mxu0 %v39_v17  ;;  %v69_v28 = vld [vmem:[%s1161_s1 + $0x148] sm:$0xff]  ;;  %v84_v30 = vld [vmem:[%s1161_s1 + $0x1c0] sm:$0xff]  ;;  %v35_v33 = vld [vmem:[%s1161_s1 + $0x38] sm:$0xff] }
   0xc   :  { %582 = vmatprep.subr.mxu1 %v87_v18  ;;  %549 = vmatprep.subr.mxu0 %v54_v19  ;;  %v68_v32 = vld [vmem:[%s1161_s1 + $0x140] sm:$0xff]  ;;  %v83_v34 = vld [vmem:[%s1161_s1 + $0x1b8] sm:$0xff]  ;;  %v50_v35 = vld [vmem:[%s1161_s1 + $0xb0] sm:$0xff] }
   0xd   :  { %583 = vmatpush3.msra.mxu1 %v71_v20  ;;  %550 = vmatpush3.msra.mxu0 %v38_v21  ;;  %v67_v36 = vld [vmem:[%s1161_s1 + $0x138] sm:$0xff]  ;;  %v34_v37 = vld [vmem:[%s1161_s1 + $0x30] sm:$0xff]  ;;  %v49_v39 = vld [vmem:[%s1161_s1 + $0xa8] sm:$0xff] }
   0xe   :  { %584 = vmatprep.subr.mxu1 %v86_v22  ;;  %551 = vmatprep.subr.mxu0 %v53_v23  ;;  %v82_v38 = vld [vmem:[%s1161_s1 + $0x1b0] sm:$0xff]  ;;  %v33_v41 = vld [vmem:[%s1161_s1 + $0x28] sm:$0xff]  ;;  %v48_v43 = vld [vmem:[%s1161_s1 + $0xa0] sm:$0xff] }
   0xf   :  { %585 = vmatpush3.msra.mxu1 %v70_v24  ;;  %552 = vmatpush3.msra.mxu0 %v37_v25  ;;  %v66_v40 = vld [vmem:[%s1161_s1 + $0x130] sm:$0xff]  ;;  %v81_v42 = vld [vmem:[%s1161_s1 + $0x1a8] sm:$0xff]  ;;  %v32_v45 = vld [vmem:[%s1161_s1 + $0x20] sm:$0xff] }
  0x10   :  { %586 = vmatprep.subr.mxu1 %v85_v26  ;;  %553 = vmatprep.subr.mxu0 %v52_v27  ;;  %v65_v44 = vld [vmem:[%s1161_s1 + $0x128] sm:$0xff]  ;;  %v80_v46 = vld [vmem:[%s1161_s1 + $0x1a0] sm:$0xff]  ;;  %v47_v47 = vld [vmem:[%s1161_s1 + $0x98] sm:$0xff] }
  0x11   :  { %587 = vmatpush3.msra.mxu1 %v69_v28  ;;  %554 = vmatpush3.msra.mxu0 %v36_v29  ;;  %v64_v48 = vld [vmem:[%s1161_s1 + $0x120] sm:$0xff]  ;;  %v31_v49 = vld [vmem:[%s1161_s1 + $0x18] sm:$0xff]  ;;  %v46_v51 = vld [vmem:[%s1161_s1 + $0x90] sm:$0xff] }
  0x12   :  { %588 = vmatprep.subr.mxu1 %v84_v30  ;;  %555 = vmatprep.subr.mxu0 %v51_v31  ;;  %v79_v50 = vld [vmem:[%s1161_s1 + $0x198] sm:$0xff]  ;;  %v30_v53 = vld [vmem:[%s1161_s1 + $0x10] sm:$0xff]  ;;  %v45_v55 = vld [vmem:[%s1161_s1 + $0x88] sm:$0xff] }
  0x13   :  { %589 = vmatpush3.msra.mxu1 %v68_v32  ;;  %556 = vmatpush3.msra.mxu0 %v35_v33  ;;  %v63_v52 = vld [vmem:[%s1161_s1 + $0x118] sm:$0xff]  ;;  %v78_v54 = vld [vmem:[%s1161_s1 + $0x190] sm:$0xff]  ;;  %v29_v57 = vld [vmem:[%s1161_s1 + $0x8] sm:$0xff] }
  0x14   :  { %590 = vmatprep.subr.mxu1 %v83_v34  ;;  %557 = vmatprep.subr.mxu0 %v50_v35  ;;  %v62_v56 = vld [vmem:[%s1161_s1 + $0x110] sm:$0xff]  ;;  %v77_v58 = vld [vmem:[%s1161_s1 + $0x188] sm:$0xff]  ;;  %v44_v59 = vld [vmem:[%s1161_s1 + $0x80] sm:$0xff] }
  0x15   :  { %591 = vmatpush3.msra.mxu1 %v67_v36  ;;  %558 = vmatpush3.msra.mxu0 %v34_v37  ;;  %v22_v60 = vld [vmem:[%s1160_s0 + $0x8] sm:$0xff]  ;;  %v28_v61 = vld [vmem:[%s1161_s1] sm:$0xff]  ;;  %v123_v1 = vld [vmem:[%s1161_s1 + $0x2f8] sm:$0xff] }
  0x16   :  { %592 = vmatprep.subr.mxu1 %v82_v38  ;;  %559 = vmatprep.subr.mxu0 %v49_v39  ;;  %v61_v62 = vld [vmem:[%s1161_s1 + $0x108] sm:$0xff]  ;;  %v21_v63 = vld [vmem:[%s1160_s0] sm:$0xff]  ;;  %v24_v3 = vld [vmem:[%s1160_s0 + $0x18] sm:$0xff] }
  0x17   :  { %593 = vmatpush3.msra.mxu1 %v66_v40  ;;  %560 = vmatpush3.msra.mxu0 %v33_v41  ;;  %v76_v0 = vld [vmem:[%s1161_s1 + $0x180] sm:$0xff]  ;;  %v107_v4 = vld [vmem:[%s1161_s1 + $0x278] sm:$0xff]  ;;  %v23_v5 = vld [vmem:[%s1160_s0 + $0x10] sm:$0xff] }
  0x18   :  { %594 = vmatprep.subr.mxu1 %v81_v42  ;;  %561 = vmatprep.subr.mxu0 %v48_v43  ;;  %v60_v2 = vld [vmem:[%s1161_s1 + $0x100] sm:$0xff]  ;;  %v122_v6 = vld [vmem:[%s1161_s1 + $0x2f0] sm:$0xff]  ;;  %v26_v8 = vld [vmem:[%s1160_s0 + $0x28] sm:$0xff] }
  0x19   :  { %595 = vmatpush3.msra.mxu1 %v65_v44  ;;  %562 = vmatpush3.msra.mxu0 %v32_v45  ;;  %v106_v7 = vld [vmem:[%s1161_s1 + $0x270] sm:$0xff]  ;;  %v121_v9 = vld [vmem:[%s1161_s1 + $0x2e8] sm:$0xff] }
  0x1a   :  { %596 = vmatprep.subr.mxu1 %v80_v46  ;;  %563 = vmatprep.subr.mxu0 %v47_v47 }
  0x1b   :  { %597 = vmatpush3.msra.mxu1 %v64_v48  ;;  %564 = vmatpush3.msra.mxu0 %v31_v49 }
  0x1c   :  { %598 = vmatprep.subr.mxu1 %v79_v50  ;;  %565 = vmatprep.subr.mxu0 %v46_v51 }
  0x1d   :  { %599 = vmatpush3.msra.mxu1 %v63_v52  ;;  %566 = vmatpush3.msra.mxu0 %v30_v53 }
  0x1e   :  { %600 = vmatprep.subr.mxu1 %v78_v54  ;;  %567 = vmatprep.subr.mxu0 %v45_v55 }
  0x1f   :  { %601 = vmatpush3.msra.mxu1 %v62_v56  ;;  %568 = vmatpush3.msra.mxu0 %v29_v57 }
  0x20   :  { %602 = vmatprep.subr.mxu1 %v77_v58  ;;  %569 = vmatprep.subr.mxu0 %v44_v59 }
  0x21   :  { %201 = vmatprep.mubr.f32.mxu0 %v22_v60  ;;  %570 = vmatpush3.msra.mxu0 %v28_v61 }
  0x22   :  { %603 = vmatpush3.msra.mxu1 %v61_v62  ;;  %202 = vmatmul.mubr.f32.vlgmr.msra.gmra.mxu0 %v21_v63 }
  0x23   :  { %604 = vmatprep.subr.mxu1 %v76_v0  ;;  %609 = vmatprep.subr.mxu0 %v123_v1 }
  0x24   :  { %605 = vmatpush3.msra.mxu1 %v60_v2  ;;  %271 = vmatprep.mubr.f32.mxu1 %v24_v3 }
  0x25   :  { %610 = vmatpush3.msra.mxu0 %v107_v4 }
  0x26   :  { %10 = vsyncpa [#allocation3], 0  ;;  %272 = vmatmul.mubr.f32.vlgmr.msra.gmra.mxu1 %v23_v5  ;;  %611 = vmatprep.subr.mxu0 %v122_v6  ;;  %v105_v10 = vld [vmem:[%s1161_s1 + $0x268] sm:$0xff]  ;;  %v120_v12 = vld [vmem:[%s1161_s1 + $0x2e0] sm:$0xff]  ;;  %v735_v14 = vmov 0.0   ;;  %vm133_vm0 = vcmask 130048  }
  0x27   :  { %v125_v11 = vld [vmem:[%s1161_s1 + $0x308] sm:$0xff]  ;;  %612 = vmatpush3.msra.mxu0 %v106_v7  ;;  %341 = vmatprep.mubr.f32.mxu0 %v26_v8  ;;  %v104_v13 = vld [vmem:[%s1161_s1 + $0x260] sm:$0xff]  ;;  %v119_v16 = vld [vmem:[%s1161_s1 + $0x2d8] sm:$0xff]  ;;  %vm736_vm1 = vmmov 0  }
  0x28   :  { %613 = vmatprep.subr.mxu0 %v121_v9  ;;  %664 = vmatprep.subr.mxu1 %v735_v14  ;;  %v124_v15 = vld [vmem:[%s1161_s1 + $0x300] sm:$0xff]  ;;  %v103_v17 = vld [vmem:[%s1161_s1 + $0x258] sm:$0xff]  ;;  %v27_v18 = vld [vmem:[%s1160_s0 + $0x30] sm:$0xff] }
  0x29   :  { %614 = vmatpush3.msra.mxu0 %v105_v10  ;;  %665 = vmatpush3.msra.mxu1 %v125_v11  ;;  %v118_v19 = vld [vmem:[%s1161_s1 + $0x2d0] sm:$0xff]  ;;  %v117_v21 = vld [vmem:[%s1161_s1 + $0x2c8] sm:$0xff]  ;;  %v116_v23 = vld [vmem:[%s1161_s1 + $0x2c0] sm:$0xff] }
  0x2a   :  { %615 = vmatprep.subr.mxu0 %v120_v12  ;;  %666 = vmatprep.subr.mxu1 %v735_v14  ;;  %v102_v20 = vld [vmem:[%s1161_s1 + $0x250] sm:$0xff]  ;;  %v101_v22 = vld [vmem:[%s1161_s1 + $0x248] sm:$0xff]  ;;  %v100_v24 = vld [vmem:[%s1161_s1 + $0x240] sm:$0xff] }
  0x2b   :  { %616 = vmatpush3.msra.mxu0 %v104_v13  ;;  %667 = vmatpush3.msra.mxu1 %v124_v15  ;;  %v115_v25 = vld [vmem:[%s1161_s1 + $0x2b8] sm:$0xff]  ;;  %v114_v27 = vld [vmem:[%s1161_s1 + $0x2b0] sm:$0xff]  ;;  %v113_v29 = vld [vmem:[%s1161_s1 + $0x2a8] sm:$0xff] }
  0x2c   :  { %617 = vmatprep.subr.mxu0 %v119_v16  ;;  %668 = vmatprep.mubr.msk.f32.mxu1 %vm736_vm1, %v735_v14  ;;  %v99_v26 = vld [vmem:[%s1161_s1 + $0x238] sm:$0xff]  ;;  %v98_v28 = vld [vmem:[%s1161_s1 + $0x230] sm:$0xff]  ;;  %v97_v30 = vld [vmem:[%s1161_s1 + $0x228] sm:$0xff] }
  0x2d   :  { %618 = vmatpush3.msra.mxu0 %v103_v17  ;;  %669 = vmatmul.mubr.msk.f32.vlgmr.msra.gmra.mxu1 %vm133_vm0, %v27_v18  ;;  %v112_v31 = vld [vmem:[%s1161_s1 + $0x2a0] sm:$0xff]  ;;  %v111_v33 = vld [vmem:[%s1161_s1 + $0x298] sm:$0xff]  ;;  %v110_v35 = vld [vmem:[%s1161_s1 + $0x290] sm:$0xff] }
  0x2e   :  { %619 = vmatprep.subr.mxu0 %v118_v19  ;;  %671 = vmatprep.subr.mxu1 %v735_v14  ;;  %v96_v32 = vld [vmem:[%s1161_s1 + $0x220] sm:$0xff]  ;;  %v95_v34 = vld [vmem:[%s1161_s1 + $0x218] sm:$0xff]  ;;  %v94_v36 = vld [vmem:[%s1161_s1 + $0x210] sm:$0xff] }
  0x2f   :  { %620 = vmatpush3.msra.mxu0 %v102_v20  ;;  %703 = vmatprep.mubr.msk.f32.mxu1 %vm736_vm1, %v735_v14  ;;  %v109_v37 = vld [vmem:[%s1161_s1 + $0x288] sm:$0xff]  ;;  %v108_v39 = vld [vmem:[%s1161_s1 + $0x280] sm:$0xff]  ;;  %v433_v42 = vld [vmem:[%s1163_s3 + $0x78] sm:$0xff] }
  0x30   :  { %621 = vmatprep.subr.mxu0 %v117_v21  ;;  %v93_v38 = vld [vmem:[%s1161_s1 + $0x208] sm:$0xff]  ;;  %v92_v40 = vld [vmem:[%s1161_s1 + $0x200] sm:$0xff]  ;;  %v432_v43 = vld [vmem:[%s1163_s3 + $0x70] sm:$0xff]  ;;  %672 = vmatpush3.msra.mxu1 %v433_v42 }
  0x31   :  { %622 = vmatpush3.msra.mxu0 %v101_v22  ;;  %v25_v41 = vld [vmem:[%s1160_s0 + $0x20] sm:$0xff]  ;;  %673 = vmatprep.subr.mxu1 %v735_v14  ;;  %v431_v44 = vld [vmem:[%s1163_s3 + $0x68] sm:$0xff]  ;;  %v429_v46 = vld [vmem:[%s1163_s3 + $0x58] sm:$0xff] }
  0x32   :  { %623 = vmatprep.subr.mxu0 %v116_v23  ;;  %674 = vmatpush3.msra.mxu1 %v432_v43  ;;  %v430_v45 = vld [vmem:[%s1163_s3 + $0x60] sm:$0xff]  ;;  %v428_v47 = vld [vmem:[%s1163_s3 + $0x50] sm:$0xff]  ;;  %v427_v48 = vld [vmem:[%s1163_s3 + $0x48] sm:$0xff] }
  0x33   :  { %624 = vmatpush3.msra.mxu0 %v100_v24  ;;  %675 = vmatprep.subr.mxu1 %v735_v14  ;;  %v426_v49 = vld [vmem:[%s1163_s3 + $0x40] sm:$0xff]  ;;  %v425_v50 = vld [vmem:[%s1163_s3 + $0x38] sm:$0xff]  ;;  %v424_v51 = vld [vmem:[%s1163_s3 + $0x30] sm:$0xff] }
  0x34   :  { %625 = vmatprep.subr.mxu0 %v115_v25  ;;  %676 = vmatpush3.msra.mxu1 %v431_v44  ;;  %v423_v52 = vld [vmem:[%s1163_s3 + $0x28] sm:$0xff]  ;;  %v422_v53 = vld [vmem:[%s1163_s3 + $0x20] sm:$0xff]  ;;  %v421_v54 = vld [vmem:[%s1163_s3 + $0x18] sm:$0xff] }
  0x35   :  { %626 = vmatpush3.msra.mxu0 %v99_v26  ;;  %677 = vmatprep.subr.mxu1 %v735_v14  ;;  %v420_v55 = vld [vmem:[%s1163_s3 + $0x10] sm:$0xff]  ;;  %v419_v56 = vld [vmem:[%s1163_s3 + $0x8] sm:$0xff]  ;;  %v418_v57 = vld [vmem:[%s1163_s3] sm:$0xff] }
  0x36   :  { %627 = vmatprep.subr.mxu0 %v114_v27  ;;  %678 = vmatpush3.msra.mxu1 %v430_v45  ;;  %v536_v1 = vld [vmem:[%s1162_s2] ss:$0 sm:$0xff]  ;;  %s737_s2 = smov [#allocation2]  }
  0x37   :  { %628 = vmatpush3.msra.mxu0 %v98_v28  ;;  %679 = vmatprep.subr.mxu1 %v735_v14  ;;  %v538_v11 = vld [vmem:[%s1164_s4] ss:$0 sm:$0xff]  ;;  %s528_s9 = sshll.u32 %s737_s2, 4  ;;  %s529_s9 = int_to_ptr.vmem [resolvable:$true] %s528_s9 }
  0x38   :  { %629 = vmatprep.subr.mxu0 %v113_v29  ;;  %680 = vmatpush3.msra.mxu1 %v429_v46  ;;  %s713_s4 = scalar_lea.vmem %s529_s9, 128  ;;  %p718_p1 = scmp.lt.s32.totalorder %s529_s9, %s529_s9 }
  0x39   :  { %630 = vmatpush3.msra.mxu0 %v97_v30  ;;  %681 = vmatprep.subr.mxu1 %v735_v14  ;;  %p714_p0 = scmp.ne.s32.totalorder %s529_s9, %s713_s4  ;;  %p719_p2 = scmp.lt.s32.totalorder %s713_s4, %s713_s4 }
  0x3a   :  { %631 = vmatprep.subr.mxu0 %v112_v31  ;;  %682 = vmatpush3.msra.mxu1 %v428_v47 }
  0x3b   :  { %632 = vmatpush3.msra.mxu0 %v96_v32  ;;  %683 = vmatprep.subr.mxu1 %v735_v14  ;;  %p720_p3 = por %p719_p2, %p718_p1 }
  0x3c   :  { %633 = vmatprep.subr.mxu0 %v111_v33  ;;  %684 = vmatpush3.msra.mxu1 %v427_v48 }
  0x3d   :  { %634 = vmatpush3.msra.mxu0 %v95_v34  ;;  %685 = vmatprep.subr.mxu1 %v735_v14  ;;  %p721_p4 = pnand %p720_p3, %p714_p0 }
  0x3e   :  { %635 = vmatprep.subr.mxu0 %v110_v35  ;;  %686 = vmatpush3.msra.mxu1 %v426_v49 }
  0x3f   :  { %636 = vmatpush3.msra.mxu0 %v94_v36  ;;  %687 = vmatprep.subr.mxu1 %v735_v14 }
  0x40   :  { %637 = vmatprep.subr.mxu0 %v109_v37  ;;  %688 = vmatpush3.msra.mxu1 %v425_v50 }
  0x41   :  { %638 = vmatpush3.msra.mxu0 %v93_v38  ;;  %689 = vmatprep.subr.mxu1 %v735_v14 }
  0x42   :  { %639 = vmatprep.subr.mxu0 %v108_v39  ;;  %690 = vmatpush3.msra.mxu1 %v424_v51 }
  0x43   :  { %640 = vmatpush3.msra.mxu0 %v92_v40  ;;  %691 = vmatprep.subr.mxu1 %v735_v14 }
  0x44   :  { %342 = vmatmul.mubr.f32.vlgmr.msra.gmra.mxu0 %v25_v41  ;;  %692 = vmatpush3.msra.mxu1 %v423_v52 }
  0x45   :  { %693 = vmatprep.subr.mxu1 %v735_v14 }
  0x46   :  { %694 = vmatpush3.msra.mxu1 %v422_v53 }
  0x47   :  { %695 = vmatprep.subr.mxu1 %v735_v14 }
  0x48   :  { %696 = vmatpush3.msra.mxu1 %v421_v54 }
  0x49   :  { %697 = vmatprep.subr.mxu1 %v735_v14 }
  0x4a   :  { %698 = vmatpush3.msra.mxu1 %v420_v55 }
  0x4b   :  { %699 = vmatprep.subr.mxu1 %v735_v14 }
  0x4c   :  { %700 = vmatpush3.msra.mxu1 %v419_v56 }
  0x4d   :  { %701 = vmatprep.subr.mxu1 %v735_v14 }
  0x4e   :  { %702 = vmatpush3.msra.mxu1 %v418_v57 }
  0xe2   :  { %v571_v62 = vpop.f32.mrf.mxu0 }
  0xe4   :  { %v572_v63 = vpop.f32.mrf.mxu0 }
  0xe5   :  { %v573_v0 = vadd.f32 %v572_v63, %v571_v62 }
  0xe6   :  { %v606_v58 = vpop.f32.mrf.mxu1 }
  0xe7   :  { %v204_v2 = vadd.f32 %v573_v0, %v536_v1 }
  0xe8   :  { %v607_v59 = vpop.f32.mrf.mxu1 }
  0xe9   :  { %v608_v3 = vadd.f32 %v607_v59, %v606_v58 }
  0xeb   :  { %v274_v6 = vadd.f32 %v608_v3, %v204_v2 }
  0xed   :  { %v413_v60 = vpop.f32.mrf.mxu1 }
  0xef   :  { %v670_v61 = vpop.f32.mrf.mxu1 }
 0x104   :  { %v641_v4 = vpop.f32.mrf.mxu0 }
 0x106   :  { %v642_v5 = vpop.f32.mrf.mxu0 }
 0x107   :  { %v643_v7 = vadd.f32 %v642_v5, %v641_v4 }
 0x109   :  { %v344_v8 = vadd.f32 %v643_v7, %v274_v6 }
 0x10b   :  { %v414_v9 = vadd.f32 %v413_v60, %v344_v8 }
 0x10d   :  { %v417_v10 = vmax.f32 %v414_v9, 0.0 }
 0x10f   :  { %704 = vmatmul.mubr.f32.vlgmr.msra.gmra.mxu1 %v417_v10 }
 0x1cf   :  { %v507_v12 = vpop.f32.mrf.mxu1 }
 0x1d0   :  { %v508_v13 = vadd.f32 %v538_v11, %v507_v12 }
 0x1d1   :  { %v705_v14 = vpop.f32.mrf.mxu1 }
 0x1d2   :  { %511 = vmax.xlane.f32.xlu0 %v508_v13 }
 0x25b   :  { %v512_v15 = vpop.xlane.xlu0 %511 }
 0x25c   :  { %v513_v16 = vsub.f32 %v508_v13, %v512_v15 }
 0x25e   :  { %v514_v17 = vmul.f32 1.442695, %v513_v16 }
 0x260   :  { %709 = vpow2.f32 %v514_v17 }
 0x26d   :  { %v710_v18 = vpop.eup %709 }
 0x26e   :  { %516 = vadd.xlane.f32.xlu0 %v710_v18 }
 0x2f7   :  { %v517_v19 = vpop.xlane.xlu0 %516 }
 0x2f8   :  { %711 = vlog2.f32 %v517_v19 }
 0x305   :  { %v712_v20 = vpop.eup %711 }
 0x306   :  { %v519_v21 = vmul.f32 0.6931472, %v712_v20 }
 0x308   :  { %v520_v22 = vsub.f32 %v513_v16, %v519_v21 }
 0x30a   :  { %521 = vst [vmem:[#allocation2] sm:$0xff] %v520_v22 }
 0x30b   :  { %724 = shalt.err (!%p721_p4)
}
 0x30c   :  { %531 = dma.vmem_to_hbm [thread:$0]  %s529_s9, 128, %s1165_s5, [#allocation3]  }
 0x30d   :  { %733 = dma.done.wait [#allocation3], 128  }
 0x30e   :  { %734 = vsyncadd [#allocation3], 4294967168 }
 0x30f   :  { %535 = vsyncpa [#allocation3], 1 }

</bundles_post_ra>
